<compile_context>
chip_gen: v7x
topology: tpu7x:2x2x1
jax: 0.10.0
libtpu: 0.0.40
codegen_flags: <defaults>
</compile_context>

<pallas_src>
import jax
import jax.numpy as jnp
from jax.experimental import pallas as pl
from jax.experimental.pallas import tpu as pltpu


def gmf_kernel(u_ref, i_ref, s_ref, b_ref, o_ref):
    # u_ref, i_ref: (bm, G*D) lane-packed embeddings (G batch rows per packed row)
    # s_ref:        (G*D, G) block-diagonal affine weight (weight folded in)
    # b_ref:        (1,) affine bias in SMEM
    # o_ref:        (bm, G) sigmoid ratings; batch index = packed_row * G + group
    prod = u_ref[...] * i_ref[...]                                  # VPU elementwise product
    logits = jnp.dot(prod, s_ref[...],                              # segmented lane reduction
                     preferred_element_type=jnp.float32)            # (bm, G)
    o_ref[...] = jax.nn.sigmoid(logits + b_ref[0]).astype(o_ref.dtype)


def gmf_pallas(user_emb, item_emb, affine_w, affine_b, *, bm=1024):
    """user_emb/item_emb: (B, D) f32, affine_w: (1, D), affine_b: (1,) -> (B, 1) f32."""
    B, D = user_emb.shape

    # Lane packing factor: fold G batch rows into the 128-lane dimension.
    G = 128 // D if (D <= 128 and 128 % D == 0) else 1
    GD = G * D

    # Pad the batch so the packed row count is a multiple of the tile height.
    R = pl.cdiv(B, G)                                       # packed rows needed
    bm_eff = bm if R >= bm else max(8, ((R + 7) // 8) * 8)   # sublane-aligned tile height
    Rpad = pl.cdiv(R, bm_eff) * bm_eff
    Bpad = Rpad * G
    if Bpad != B:
        pad = ((0, Bpad - B), (0, 0))
        user_emb = jnp.pad(user_emb, pad)
        item_emb = jnp.pad(item_emb, pad)

    u = user_emb.reshape(Rpad, GD)                # free reshape (row-major contiguous)
    it = item_emb.reshape(Rpad, GD)

    # Block-diagonal affine matrix: S[g*D + d, h] = w[d] if g == h else 0.
    w = affine_w.reshape(-1).astype(jnp.float32)                       # (D,)
    s_mat = (jnp.eye(G, dtype=jnp.float32)[:, None, :]
             * w[None, :, None]).reshape(GD, G)
    bias = affine_b.reshape(1).astype(jnp.float32)                     # (1,) SMEM scalar

    out = pl.pallas_call(
        gmf_kernel,
        out_shape=jax.ShapeDtypeStruct((Rpad, G), jnp.float32),
        grid_spec=pltpu.PrefetchScalarGridSpec(
            num_scalar_prefetch=0,
            grid=(Rpad // bm_eff,),
            in_specs=[
                pl.BlockSpec((bm_eff, GD), lambda t: (t, 0)),       # user embeddings tile
                pl.BlockSpec((bm_eff, GD), lambda t: (t, 0)),       # item embeddings tile
                pl.BlockSpec((GD, G), lambda t: (0, 0)),            # folded affine weight (resident)
                pl.BlockSpec(memory_space=pltpu.MemorySpace.SMEM),  # bias scalar in SMEM
            ],
            out_specs=pl.BlockSpec((bm_eff, G), lambda t: (t, 0)),
        ),
        compiler_params=pltpu.CompilerParams(
            dimension_semantics=("parallel",)),
    )(u, it, s_mat, bias)

    # Unpack: out[r, g] is the rating for batch row r*G + g.
    return out.reshape(Bpad, 1)[:B]


def gmf_forward(params, users, items):
    # Embedding-table gather in XLA glue (see TODO at top re: in-kernel fusion).
    user_emb = jnp.take(params["embedding_user"], users, axis=0)   # (B, D)
    item_emb = jnp.take(params["embedding_item"], items, axis=0)   # (B, D)
    return gmf_pallas(user_emb, item_emb, params["affine_w"], params["affine_b"])


def init_params(key, num_users, num_items, latent_dim):
    k1, k2, k3, k4 = jax.random.split(key, 4)
    bound = 1.0 / float(latent_dim) ** 0.5
    return {
        # nn.Embedding default init ~ N(0, 1)
        "embedding_user": jax.random.normal(k1, (num_users, latent_dim), jnp.float32),
        "embedding_item": jax.random.normal(k2, (num_items, latent_dim), jnp.float32),
        # nn.Linear(latent_dim, 1): weight (1, latent_dim) lane-major, bias (1,)
        "affine_w": jax.random.uniform(k3, (1, latent_dim), jnp.float32,
                                       minval=-bound, maxval=bound),
        "affine_b": jax.random.uniform(k4, (1,), jnp.float32,
                                       minval=-bound, maxval=bound),
    }


if __name__ == "__main__":
    num_users, num_items, latent_dim = 32, 48, 32
    batch = 64

    key = jax.random.PRNGKey(0)
    kp, ku, ki = jax.random.split(key, 3)
    params = init_params(kp, num_users, num_items, latent_dim)
    users = jax.random.randint(ku, (batch,), 0, num_users, dtype=jnp.int32)
    items = jax.random.randint(ki, (batch,), 0, num_items, dtype=jnp.int32)

    out = gmf_forward(params, users, items)
    out = jax.block_until_ready(out)

    # Pure-JAX reference check (silent)
    ue = jnp.take(params["embedding_user"], users, axis=0)
    ie = jnp.take(params["embedding_item"], items, axis=0)
    ref = jax.nn.sigmoid((ue * ie) @ params["affine_w"].T + params["affine_b"][0])
    assert out.shape == (batch, 1)
    assert jnp.allclose(out, ref, atol=1e-5, rtol=1e-5)

    print("KERNEL_OK")
</pallas_src>

<mosaic_0001>
module attributes {stable_mosaic.version = 11 : i64} {
  func.func @gmf_kernel(%arg0: i32, %arg1: memref<16x128xf32, #tpu.memory_space<vmem>>, %arg2: memref<16x128xf32, #tpu.memory_space<vmem>>, %arg3: memref<128x4xf32, #tpu.memory_space<vmem>>, %arg4: memref<1xf32, #tpu.memory_space<smem>>, %arg5: memref<16x4xf32, #tpu.memory_space<vmem>>) attributes {dimension_semantics = [#tpu.dimension_semantics<parallel>], iteration_bounds = array<i64: 1>, scalar_prefetch = 0 : i64, scratch_operands = 0 : i64, tpu.core_type = #tpu.core_type<tc>, window_params = [{transform_indices = @transform_0, window_bounds = array<i64: 16, 128>}, {transform_indices = @transform_1, window_bounds = array<i64: 16, 128>}, {pipeline_mode = #tpu.pipeline_mode<synchronous>, transform_indices = @transform_2, window_bounds = array<i64: 128, 4>}, {transform_indices = @transform_3, window_bounds = array<i64: 1>}, {transform_indices = @transform_4, window_bounds = array<i64: 16, 4>}]} {
    %c0 = arith.constant 0 : index
    %c0_0 = arith.constant 0 : index
    %0 = vector.load %arg1[%c0, %c0_0] : memref<16x128xf32, #tpu.memory_space<vmem>>, vector<16x128xf32>
    %c0_1 = arith.constant 0 : index
    %c0_2 = arith.constant 0 : index
    %1 = vector.load %arg2[%c0_1, %c0_2] : memref<16x128xf32, #tpu.memory_space<vmem>>, vector<16x128xf32>
    %2 = arith.mulf %0, %1 : vector<16x128xf32>
    %c0_3 = arith.constant 0 : index
    %c0_4 = arith.constant 0 : index
    %3 = vector.load %arg3[%c0_3, %c0_4] : memref<128x4xf32, #tpu.memory_space<vmem>>, vector<128x4xf32>
    %cst = arith.constant dense<0.000000e+00> : vector<16x4xf32>
    %4 = tpu.matmul %2, %3, %cst {dimension_numbers = #tpu.dot_dimension_numbers<[1], [0], [0], [1], [0, 0, 1, 1], [], []>} : vector<16x128xf32>, vector<128x4xf32>, vector<16x4xf32> -> vector<16x4xf32>
    %c0_5 = arith.constant 0 : index
    %5 = memref.load %arg4[%c0_5] : memref<1xf32, #tpu.memory_space<smem>>
    %6 = vector.broadcast %5 : f32 to vector<16x4xf32>
    %7 = arith.addf %4, %6 : vector<16x4xf32>
    %8 = arith.negf %7 : vector<16x4xf32>
    %9 = math.exp %8 : vector<16x4xf32>
    %cst_6 = arith.constant 1.000000e+00 : f32
    %10 = vector.broadcast %cst_6 : f32 to vector<16x4xf32>
    %11 = arith.addf %10, %9 : vector<16x4xf32>
    %12 = arith.divf %10, %11 : vector<16x4xf32>
    %c0_7 = arith.constant 0 : index
    %c0_8 = arith.constant 0 : index
    %13 = vector.load %arg5[%c0_7, %c0_8] : memref<16x4xf32, #tpu.memory_space<vmem>>, vector<16x4xf32>
    tpu.vector_store %arg5[%c0_7, %c0_8], %12 {strides = array<i32>} : memref<16x4xf32, #tpu.memory_space<vmem>>, vector<16x4xf32>,
    return
  }
  func.func @transform_0(%arg0: i32) -> (i32, i32) {
    %c0_i32 = arith.constant 0 : i32
    %c0_i32_0 = arith.constant 0 : i32
    return %arg0, %c0_i32 : i32, i32
  }
  func.func @transform_1(%arg0: i32) -> (i32, i32) {
    %c0_i32 = arith.constant 0 : i32
    %c0_i32_0 = arith.constant 0 : i32
    return %arg0, %c0_i32 : i32, i32
  }
  func.func @transform_2(%arg0: i32) -> (i32, i32) {
    %c0_i32 = arith.constant 0 : i32
    %c0_i32_0 = arith.constant 0 : i32
    %c0_i32_1 = arith.constant 0 : i32
    return %c0_i32, %c0_i32_0 : i32, i32
  }
  func.func @transform_3(%arg0: i32) -> i32 {
    %c0_i32 = arith.constant 0 : i32
    %c0_i32_0 = arith.constant 0 : i32
    return %c0_i32 : i32
  }
  func.func @transform_4(%arg0: i32) -> (i32, i32) {
    %c0_i32 = arith.constant 0 : i32
    %c0_i32_0 = arith.constant 0 : i32
    return %arg0, %c0_i32 : i32, i32
  }
}

</mosaic_0001>

<bundles_post_ra>
// kernel: tpu_custom_call.1
= control target key start
LH: loop header
LB: loop body
LE: loop exit
PB: predicated region body
PF: predicated region fallthrough
CT: control target
= control target key end

     0   :  { %vm129_vm0 = vcmask 31744   ;;  %s325_s2 = inlined_call_operand.vmem [shape: f32[128,4], index: 2, kind: input, shape index: {}]   ;;  %s326_s0 = inlined_call_operand.vmem [shape: f32[16,128], index: 0, kind: input, shape index: {}]   ;;  %s327_s1 = inlined_call_operand.vmem [shape: f32[16,128], index: 1, kind: input, shape index: {}]   ;;  %s328_s3 = inlined_call_operand.<no memory space> [shape: f32[1], index: 3, kind: input, shape index: {}]   ;;  %s329_s4 = inlined_call_operand.vmem [shape: f32[16,4], index: 4, kind: output, shape index: {}]  }
   0x1   :  { %v24_v0 = vld [vmem:[%s325_s2] sm:$0xff]  ;;  %v25_v1 = vld [vmem:[%s325_s2 + $0x8] sm:$0xff]  ;;  %v26_v2 = vld [vmem:[%s325_s2 + $0x10] sm:$0xff]  ;;  %v41_v30 = vstv %s328_s3 }
   0x2   :  { %v191_v3 = vpack.c.bf16 %v25_v1, %v24_v0  ;;  %v27_v4 = vld [vmem:[%s325_s2 + $0x18] sm:$0xff]  ;;  %v28_v6 = vld [vmem:[%s325_s2 + $0x20] sm:$0xff]  ;;  %v29_v7 = vld [vmem:[%s325_s2 + $0x28] sm:$0xff] }
   0x3   :  { %v195_v5 = vpack.c.bf16 %v27_v4, %v26_v2  ;;  %v199_v8 = vpack.c.bf16 %v29_v7, %v28_v6  ;;  %v18_v9 = vld [vmem:[%s326_s0] sm:$0xff]  ;;  %v30_v10 = vld [vmem:[%s325_s2 + $0x30] sm:$0xff]  ;;  %v31_v11 = vld [vmem:[%s325_s2 + $0x38] sm:$0xff] }
   0x4   :  { %192 = vmatprep.subr.bf16.mxu0 %v191_v3  ;;  %v20_v12 = vld [vmem:[%s327_s1] sm:$0xff]  ;;  %v203_v14 = vpack.c.bf16 %v31_v11, %v30_v10  ;;  %v33_v16 = vld [vmem:[%s325_s2 + $0x48] sm:$0xff]  ;;  %v34_v18 = vld [vmem:[%s325_s2 + $0x50] sm:$0xff] }
   0x5   :  { %194 = vmatpush3.bf16.msra.mxu0 %v191_v3  ;;  %v22_v13 = vmul.f32 %v20_v12, %v18_v9  ;;  %v32_v15 = vld [vmem:[%s325_s2 + $0x40] sm:$0xff]  ;;  %v35_v19 = vld [vmem:[%s325_s2 + $0x58] sm:$0xff]  ;;  %v37_v22 = vld [vmem:[%s325_s2 + $0x68] sm:$0xff] }
   0x6   :  { %196 = vmatprep.subr.bf16.mxu0 %v195_v5  ;;  %v207_v17 = vpack.c.bf16 %v33_v16, %v32_v15  ;;  %v211_v20 = vpack.c.bf16 %v35_v19, %v34_v18  ;;  %v36_v21 = vld [vmem:[%s325_s2 + $0x60] sm:$0xff]  ;;  %v38_v24 = vld [vmem:[%s325_s2 + $0x70] sm:$0xff]  ;;  %v39_v25 = vld [vmem:[%s325_s2 + $0x78] sm:$0xff] }
   0x7   :  { %188 = vmatprep.mubr.f32.mxu0 %v22_v13  ;;  %v215_v23 = vpack.c.bf16 %v37_v22, %v36_v21  ;;  %v219_v26 = vpack.c.bf16 %v39_v25, %v38_v24  ;;  %v19_v27 = vld [vmem:[%s326_s0 + $0x8] sm:$0xff] }
   0x8   :  { %v21_v28 = vld [vmem:[%s327_s1 + $0x8] sm:$0xff] }
   0x9   :  { %198 = vmatpush3.bf16.msra.mxu0 %v195_v5  ;;  %v23_v29 = vmul.f32 %v21_v28, %v19_v27 }
   0xa   :  { %200 = vmatprep.subr.bf16.mxu0 %v199_v8 }
   0xd   :  { %202 = vmatpush3.bf16.msra.mxu0 %v199_v8 }
   0xe   :  { %204 = vmatprep.subr.bf16.mxu0 %v203_v14 }
  0x11   :  { %206 = vmatpush3.bf16.msra.mxu0 %v203_v14 }
  0x12   :  { %208 = vmatprep.subr.bf16.mxu0 %v207_v17 }
  0x15   :  { %210 = vmatpush3.bf16.msra.mxu0 %v207_v17 }
  0x16   :  { %212 = vmatprep.subr.bf16.mxu0 %v211_v20 }
  0x19   :  { %214 = vmatpush3.bf16.msra.mxu0 %v211_v20 }
  0x1a   :  { %216 = vmatprep.subr.bf16.mxu0 %v215_v23 }
  0x1d   :  { %218 = vmatpush3.bf16.msra.mxu0 %v215_v23 }
  0x1e   :  { %220 = vmatprep.subr.bf16.mxu0 %v219_v26 }
  0x21   :  { %222 = vmatpush3.bf16.msra.mxu0 %v219_v26 }
  0x24   :  { %189 = vmatmul.mubr.f32.vlgmr.msra.gmra.mrb[0].mxu0 %v23_v29 }
  0xf7   :  { %v190_v31 = vpop.f32.mrb[0].mxu0 }
  0xf8   :  { %v114_v32 = vadd.f32 %v190_v31, %v41_v30  ;;  %v108_v33 = vpop.f32.mrb[1].mxu0 }
  0xf9   :  { %v109_v34 = vadd.f32 %v108_v33, %v41_v30 }
  0xfa   :  { %v137_v35 = vmul.f32 -1.442695, %v114_v32 }
  0xfb   :  { %v136_v36 = vmul.f32 -1.442695, %v109_v34 }
  0xfc   :  { %223 = vpow2.f32 %v137_v35 }
  0xfd   :  { %225 = vpow2.f32 %v136_v36 }
 0x106   :  { %v224_v37 = vpop.eup %223 }
 0x107   :  { %v226_v38 = vpop.eup %225  ;;  %v124_v39 = vadd.f32 1.0, %v224_v37 }
 0x108   :  { %v123_v40 = vadd.f32 1.0, %v226_v38 }
 0x109   :  { %227 = vrcp.f32 %v124_v39 }
 0x10a   :  { %229 = vrcp.f32 %v123_v40 }
 0x113   :  { %v228_v41 = vpop.eup %227 }
 0x114   :  { %v230_v42 = vpop.eup %229  ;;  %131 = vst.msk [vmem:[%s329_s4 + $0x8] sm:$0xff] %vm129_vm0, %v228_v41 }
 0x115   :  { %130 = vst.msk [vmem:[%s329_s4] sm:$0xff] %vm129_vm0, %v230_v42 }

</bundles_post_ra>
